<compile_context>
chip_gen: v5e
topology: v5e:2x2
jax: 0.10.0
libtpu: 0.0.40
codegen_flags: <defaults>
</compile_context>

<pallas_src>
import functools
import math

import jax
import jax.numpy as jnp
from jax import lax
from jax.experimental import pallas as pl
from jax.experimental.pallas import tpu as pltpu


def _round_up(x, m):
    return (x + m - 1) // m * m


def _sublane_multiple(dtype):
    # packed-sublane granularity: 8 rows for 4B, 16 for 2B, 32 for 1B dtypes.
    return max(8, 32 // jnp.dtype(dtype).itemsize)


def _vmem_capacity_bytes():
    try:
        return int(pltpu.get_tpu_info().vmem_capacity_bytes)
    except Exception:
        return 64 * 1024 * 1024  # conservative default (v7x per-core VMEM)


def _is_v5_chip():
    try:
        return "v5" in jax.devices()[0].device_kind.lower()
    except Exception:
        return False


def _make_spec(block_shape, index_map, buffers=None):
    """BlockSpec helper; optionally requests a non-default buffer count."""
    if buffers is not None:
        try:
            return pl.BlockSpec(block_shape, index_map,
                                pipeline_mode=pl.Buffered(buffers))
        except Exception:
            pass  # older jax: fall back to default double buffering
    return pl.BlockSpec(block_shape, index_map)


# ---------------------------------------------------------------------------
# Kernel 1: full attention, materialises the (TQ, Nk) probability row
# (needed because the module returns attention_scores).
# ---------------------------------------------------------------------------
def _attention_kernel(q_ref, k_ref, v_ref, out_ref, scores_ref, *,
                      scale, nk_valid, scale_on_scores, bf16_exp, matmul_dtype):
    # Refs are 2D thanks to pl.Squeezed() on the batch dim:
    #   q_ref (TQ, Dk), k_ref (Nk_pad, Dk), v_ref (Nk_pad, Dv),
    #   out_ref (TQ, Dv), scores_ref (TQ, Nk_pad).
    q = q_ref[...]
    k = k_ref[...]
    v = v_ref[...]

    if not scale_on_scores:              # fold 1/sqrt(d_k) into Q (f32 inputs)
        q = q * jnp.asarray(scale, q.dtype)
    if matmul_dtype is not None:         # optional bf16 MXU path (e.g. v5e f32)
        q = q.astype(matmul_dtype)
        k = k.astype(matmul_dtype)

    # QK^T as a direct contraction (no explicit K transpose), f32 accumulation.
    s = lax.dot_general(q, k, dimension_numbers=(((1,), (1,)), ((), ())),
                        preferred_element_type=jnp.float32)  # (TQ, Nk_pad)
    if scale_on_scores:
        s = s * jnp.float32(scale)

    if nk_valid is not None:             # mask padded keys -> zero probability
        col = lax.broadcasted_iota(jnp.int32, s.shape, 1)
        s = jnp.where(col < nk_valid, s, -jnp.inf)

    # Numerically stable softmax along the key axis.
    m = jnp.max(s, axis=-1, keepdims=True)
    x = s - m
    if bf16_exp:                          # v6e/v7x bf16 EUP; never on v5
        p_narrow = jnp.exp(x.astype(jnp.bfloat16))
        p = p_narrow.astype(jnp.float32)
    else:
        p_narrow = None
        p = jnp.exp(x)
    denom = jnp.sum(p, axis=-1, keepdims=True)          # f32 accumulation
    inv = pl.reciprocal(denom, approx=False)             # exact: rows sum to 1

    pv_dtype = matmul_dtype if matmul_dtype is not None else v.dtype
    if bf16_exp and jnp.dtype(pv_dtype) == jnp.dtype(jnp.bfloat16):
        pv_in = p_narrow                  # feed bf16 exp output straight to MXU
    else:
        pv_in = p.astype(pv_dtype)
    if matmul_dtype is not None:
        v = v.astype(matmul_dtype)

    pv = jnp.dot(pv_in, v, preferred_element_type=jnp.float32)  # (TQ, Dv)
    out_ref[...] = (pv * inv).astype(out_ref.dtype)
    scores_ref[...] = (p * inv).astype(scores_ref.dtype)


# ---------------------------------------------------------------------------
# Kernel 2: flash-style attention (no scores output, no (Nq, Nk) materialisation)
# ---------------------------------------------------------------------------
def _flash_kernel(q_ref, k_ref, v_ref, o_ref, m_sc, l_sc, acc_sc, *,
                  scale, nk_valid, tk, scale_on_scores, bf16_exp, matmul_dtype):
    kv = pl.program_id(2)

    @pl.when(kv == 0)
    def _():
        m_sc[...] = jnp.full_like(m_sc, -jnp.inf)
        l_sc[...] = jnp.zeros_like(l_sc)
        acc_sc[...] = jnp.zeros_like(acc_sc)

    q = q_ref[...]
    k = k_ref[...]
    v = v_ref[...]
    if not scale_on_scores:
        q = q * jnp.asarray(scale, q.dtype)
    if matmul_dtype is not None:
        q = q.astype(matmul_dtype)
        k = k.astype(matmul_dtype)
        v = v.astype(matmul_dtype)

    s = lax.dot_general(q, k, dimension_numbers=(((1,), (1,)), ((), ())),
                        preferred_element_type=jnp.float32)  # (TQ, TK)
    if scale_on_scores:
        s = s * jnp.float32(scale)
    if nk_valid is not None:
        col = kv * tk + lax.broadcasted_iota(jnp.int32, s.shape, 1)
        s = jnp.where(col < nk_valid, s, -jnp.inf)

    m_prev = m_sc[...]
    m_new = jnp.maximum(m_prev, jnp.max(s, axis=-1, keepdims=True))
    alpha = jnp.exp(m_prev - m_new)
    x = s - m_new
    if bf16_exp:
        p = jnp.exp(x.astype(jnp.bfloat16)).astype(jnp.float32)
    else:
        p = jnp.exp(x)

    l_sc[...] = alpha * l_sc[...] + jnp.sum(p, axis=-1, keepdims=True)
    pv_dtype = matmul_dtype if matmul_dtype is not None else v_ref.dtype
    acc_sc[...] = alpha * acc_sc[...] + jnp.dot(
        p.astype(pv_dtype), v, preferred_element_type=jnp.float32)
    m_sc[...] = m_new

    @pl.when(kv == pl.num_programs(2) - 1)
    def _():
        o_ref[...] = (acc_sc[...]
                      * pl.reciprocal(l_sc[...], approx=False)).astype(o_ref.dtype)


# ---------------------------------------------------------------------------
# Wrapper
# ---------------------------------------------------------------------------
def scaled_dot_product_attention(Q, K, V, d_k=None, *, return_scores=True,
                                 matmul_dtype=None):
    """Pallas TPU Attention(Q,K,V) = softmax(QK^T/sqrt(d_k)) V.

    Returns (attention_output, attention_scores) when return_scores=True
    (matching the PyTorch module), else (attention_output, None) via a
    flash-style kernel that never materialises the full scores matrix.

    matmul_dtype: optionally cast matmul operands (e.g. jnp.bfloat16 on v5e
    for f32 inputs) while keeping f32 accumulation.
    """
    B, Nq, Dk = Q.shape
    Bk, Nk, Dk2 = K.shape
    Bv, Nkv, Dv = V.shape
    assert Dk == Dk2 and Bk == B and Bv == B and Nkv == Nk
    if d_k is None:
        d_k = Dk
    scale = 1.0 / math.sqrt(float(d_k))

    in_dtype = Q.dtype
    out_dtype = Q.dtype
    scores_dtype = Q.dtype
    in_item = jnp.dtype(in_dtype).itemsize
    out_item = jnp.dtype(out_dtype).itemsize
    sc_item = jnp.dtype(scores_dtype).itemsize

    sub = _sublane_multiple(in_dtype)
    vmem_cap = _vmem_capacity_bytes()
    budget = int(0.70 * vmem_cap)

    is_v5 = _is_v5_chip()
    bf16_exp = (jnp.dtype(in_dtype) == jnp.dtype(jnp.bfloat16)) and not is_v5
    # f32 inputs: fold 1/sqrt(d_k) into Q (free, no extra rounding).
    # narrower inputs: scale the f32 scores instead (better precision).
    scale_on_scores = jnp.dtype(in_dtype) != jnp.dtype(jnp.float32)

    # Lane-dense key axis: pad Nk to a multiple of 128; padded keys are masked
    # with -inf inside the kernel so they contribute exactly zero probability.
    Nk_pad = _round_up(Nk, 128)
    nk_valid = Nk if Nk_pad != Nk else None
    if Nk_pad != Nk:
        K = jnp.pad(K, ((0, 0), (0, Nk_pad - Nk), (0, 0)))
        V = jnp.pad(V, ((0, 0), (0, Nk_pad - Nk), (0, 0)))

    if return_scores:
        # ---- per-step VMEM footprint (conservative: double-buffered K/V) ----
        def footprint(tq):
            kv_bytes = 2 * Nk_pad * (Dk + Dv) * in_item   # resident K/V
            q_bytes = 2 * tq * Dk * in_item               # double-buffered Q
            o_bytes = 2 * tq * Dv * out_item              # double-buffered out
            sc_bytes = 2 * tq * Nk_pad * sc_item          # double-buffered scores
            tmp_bytes = 3 * tq * Nk_pad * 4               # f32 s/p/attn live values
            return kv_bytes + q_bytes + o_bytes + sc_bytes + tmp_bytes

        cap = _round_up(Nq, sub)
        cands = [t for t in (512, 256, 128, 64, 32, 16, 8)
                 if t % sub == 0 and t <= cap]
        if not cands:
            cands = [cap]
        TQ = cands[-1]
        for t in cands:                      # largest q-tile that fits VMEM
            if footprint(t) <= budget:
                TQ = t
                break

        Nq_pad = _round_up(Nq, TQ)
        if Nq_pad != Nq:
            Q = jnp.pad(Q, ((0, 0), (0, Nq_pad - Nq), (0, 0)))

        vmem_limit = int(min(0.92 * vmem_cap,
                             max(1.3 * footprint(TQ) + (4 << 20), 32 << 20)))

        kernel = functools.partial(
            _attention_kernel, scale=scale, nk_valid=nk_valid,
            scale_on_scores=scale_on_scores, bf16_exp=bf16_exp,
            matmul_dtype=matmul_dtype)

        out_shapes = (
            jax.ShapeDtypeStruct((B, Nq_pad, Dv), out_dtype),       # output
            jax.ShapeDtypeStruct((B, Nq_pad, Nk_pad), scores_dtype),  # scores
        )

        itemsize = in_item
        cost = pl.CostEstimate(
            flops=2 * B * Nq_pad * Nk_pad * (Dk + Dv),
            transcendentals=B * Nq_pad * Nk_pad,
            bytes_accessed=(B * (Nq_pad * Dk + Nk_pad * (Dk + Dv)) * itemsize
                            + B * Nq_pad * Dv * out_item
                            + B * Nq_pad * Nk_pad * sc_item),
        )

        def build_call(kv_single_buffered):
            kv_buffers = 1 if kv_single_buffered else None
            grid_spec = pltpu.PrefetchScalarGridSpec(
                num_scalar_prefetch=0,
                grid=(B, Nq_pad // TQ),  # batch leading -> megacore shards on b
                in_specs=[
                    pl.BlockSpec((pl.Squeezed(), TQ, Dk), lambda b, i: (b, i, 0)),
                    # K/V: same block for every q-tile -> resident across i.
                    # Single-buffered (Buffered(1)) to halve their VMEM share.
                    _make_spec((pl.Squeezed(), Nk_pad, Dk),
                               lambda b, i: (b, 0, 0), buffers=kv_buffers),
                    _make_spec((pl.Squeezed(), Nk_pad, Dv),
                               lambda b, i: (b, 0, 0), buffers=kv_buffers),
                ],
                out_specs=[
                    pl.BlockSpec((pl.Squeezed(), TQ, Dv), lambda b, i: (b, i, 0)),
                    pl.BlockSpec((pl.Squeezed(), TQ, Nk_pad), lambda b, i: (b, i, 0)),
                ],
            )
            return pl.pallas_call(
                kernel,
                out_shape=out_shapes,
                grid_spec=grid_spec,
                compiler_params=pltpu.CompilerParams(
                    dimension_semantics=("parallel", "parallel"),
                    vmem_limit_bytes=vmem_limit,
                ),
                cost_estimate=cost,
            )

        try:
            out, scores = build_call(True)(Q, K, V)
        except Exception:
            # Fallback for jax versions where Buffered(1) K/V is not supported.
            out, scores = build_call(False)(Q, K, V)

        if Nq_pad != Nq:
            out = out[:, :Nq, :]
        if Nq_pad != Nq or Nk_pad != Nk:
            scores = scores[:, :Nq, :Nk]
        return out, scores

    # ------------------- flash-style path (no scores output) -------------------
    TK = 512 if Nk_pad % 512 == 0 else (256 if Nk_pad % 256 == 0 else 128)

    def footprint(tq):
        kv_bytes = 2 * TK * (Dk + Dv) * in_item
        q_bytes = 2 * tq * Dk * in_item
        o_bytes = 2 * tq * Dv * out_item
        scratch = tq * (Dv + 2) * 4
        tmp_bytes = 3 * tq * TK * 4
        return kv_bytes + q_bytes + o_bytes + scratch + tmp_bytes

    cap = _round_up(Nq, sub)
    cands = [t for t in (256, 128, 64, 32, 16, 8) if t % sub == 0 and t <= cap]
    if not cands:
        cands = [cap]
    TQ = cands[-1]
    for t in cands:
        if footprint(t) <= budget:
            TQ = t
            break

    Nq_pad = _round_up(Nq, TQ)
    if Nq_pad != Nq:
        Q = jnp.pad(Q, ((0, 0), (0, Nq_pad - Nq), (0, 0)))

    vmem_limit = int(min(0.92 * vmem_cap,
                         max(1.3 * footprint(TQ) + (4 << 20), 32 << 20)))

    kernel = functools.partial(
        _flash_kernel, scale=scale, nk_valid=nk_valid, tk=TK,
        scale_on_scores=scale_on_scores, bf16_exp=bf16_exp,
        matmul_dtype=matmul_dtype)

    cost = pl.CostEstimate(
        flops=2 * B * Nq_pad * Nk_pad * (Dk + Dv),
        transcendentals=B * Nq_pad * Nk_pad,
        bytes_accessed=(B * (Nq_pad * Dk + Nk_pad * (Dk + Dv)) * in_item
                        + B * Nq_pad * Dv * out_item),
    )

    grid_spec = pltpu.PrefetchScalarGridSpec(
        num_scalar_prefetch=0,
        grid=(B, Nq_pad // TQ, Nk_pad // TK),
        in_specs=[
            pl.BlockSpec((pl.Squeezed(), TQ, Dk), lambda b, i, k: (b, i, 0)),
            pl.BlockSpec((pl.Squeezed(), TK, Dk), lambda b, i, k: (b, k, 0)),
            pl.BlockSpec((pl.Squeezed(), TK, Dv), lambda b, i, k: (b, k, 0)),
        ],
        out_specs=pl.BlockSpec((pl.Squeezed(), TQ, Dv), lambda b, i, k: (b, i, 0)),
        scratch_shapes=[
            pltpu.VMEM((TQ, 1), jnp.float32),   # running max
            pltpu.VMEM((TQ, 1), jnp.float32),   # running denom
            pltpu.VMEM((TQ, Dv), jnp.float32),  # running PV accumulator
        ],
    )

    out = pl.pallas_call(
        kernel,
        out_shape=jax.ShapeDtypeStruct((B, Nq_pad, Dv), out_dtype),
        grid_spec=grid_spec,
        compiler_params=pltpu.CompilerParams(
            dimension_semantics=("parallel", "parallel", "arbitrary"),
            vmem_limit_bytes=vmem_limit,
        ),
        cost_estimate=cost,
    )(Q, K, V)

    if Nq_pad != Nq:
        out = out[:, :Nq, :]
    return out, None


def _reference(Q, K, V, d_k):
    s = jnp.einsum("bqd,bkd->bqk", Q.astype(jnp.float32),
                   K.astype(jnp.float32)) / jnp.sqrt(jnp.float32(d_k))
    a = jax.nn.softmax(s, axis=-1)
    return jnp.einsum("bqk,bkv->bqv", a, V.astype(jnp.float32)), a


if __name__ == "__main__":
    key = jax.random.PRNGKey(0)

    # Small, deterministic shapes consistent with the module's forward.
    # First config exercises the padded/masked-Nk path; second is lane-aligned.
    for (B, Nq, Nk, Dk, Dv) in [(2, 8, 8, 32, 32), (1, 64, 128, 32, 16)]:
        kq, kk, kvk, key = jax.random.split(key, 4)
        Q = jax.random.normal(kq, (B, Nq, Dk), dtype=jnp.float32)
        K = jax.random.normal(kk, (B, Nk, Dk), dtype=jnp.float32)
        V = jax.random.normal(kvk, (B, Nk, Dv), dtype=jnp.float32)

        ref_out, ref_scores = _reference(Q, K, V, Dk)

        # Module-equivalent path (returns probabilities too).
        out, scores = scaled_dot_product_attention(Q, K, V, d_k=Dk)
        out = jax.block_until_ready(out)
        scores = jax.block_until_ready(scores)
        assert out.shape == (B, Nq, Dv) and scores.shape == (B, Nq, Nk)
        assert jnp.allclose(out, ref_out, atol=1e-4, rtol=1e-4), "output mismatch"
        assert jnp.allclose(scores, ref_scores, atol=1e-4, rtol=1e-4), "scores mismatch"

        # Flash-style path (scores not materialised).
        out2, _ = scaled_dot_product_attention(Q, K, V, d_k=Dk, return_scores=False)
        out2 = jax.block_until_ready(out2)
        assert jnp.allclose(out2, ref_out, atol=1e-4, rtol=1e-4), "flash output mismatch"

    print("KERNEL_OK")
</pallas_src>

<mosaic_0001>
module attributes {stable_mosaic.version = 11 : i64} {
  func.func @_attention_kernel(%arg0: i32, %arg1: i32, %arg2: memref<1x8x32xf32, #tpu.memory_space<vmem>>, %arg3: memref<1x128x32xf32, #tpu.memory_space<vmem>>, %arg4: memref<1x128x32xf32, #tpu.memory_space<vmem>>, %arg5: memref<1x8x32xf32, #tpu.memory_space<vmem>>, %arg6: memref<1x8x128xf32, #tpu.memory_space<vmem>>) attributes {dimension_semantics = [#tpu.dimension_semantics<parallel>, #tpu.dimension_semantics<parallel>], iteration_bounds = array<i64: 2, 1>, scalar_prefetch = 0 : i64, scratch_operands = 0 : i64, tpu.core_type = #tpu.core_type<tc>, window_params = [{transform_indices = @transform_0, window_bounds = array<i64: 1, 8, 32>}, {pipeline_mode = #tpu.pipeline_mode<synchronous>, transform_indices = @transform_1, window_bounds = array<i64: 1, 128, 32>}, {pipeline_mode = #tpu.pipeline_mode<synchronous>, transform_indices = @transform_2, window_bounds = array<i64: 1, 128, 32>}, {transform_indices = @transform_3, window_bounds = array<i64: 1, 8, 32>}, {transform_indices = @transform_4, window_bounds = array<i64: 1, 8, 128>}]} {
    %c0 = arith.constant 0 : index
    %c0_0 = arith.constant 0 : index
    %c0_1 = arith.constant 0 : index
    %0 = vector.load %arg2[%c0, %c0_0, %c0_1] : memref<1x8x32xf32, #tpu.memory_space<vmem>>, vector<1x8x32xf32>
    %1 = vector.shape_cast %0 : vector<1x8x32xf32> to vector<8x32xf32>
    %c0_2 = arith.constant 0 : index
    %c0_3 = arith.constant 0 : index
    %c0_4 = arith.constant 0 : index
    %2 = vector.load %arg3[%c0_2, %c0_3, %c0_4] : memref<1x128x32xf32, #tpu.memory_space<vmem>>, vector<1x128x32xf32>
    %3 = vector.shape_cast %2 : vector<1x128x32xf32> to vector<128x32xf32>
    %c0_5 = arith.constant 0 : index
    %c0_6 = arith.constant 0 : index
    %c0_7 = arith.constant 0 : index
    %4 = vector.load %arg4[%c0_5, %c0_6, %c0_7] : memref<1x128x32xf32, #tpu.memory_space<vmem>>, vector<1x128x32xf32>
    %5 = vector.shape_cast %4 : vector<1x128x32xf32> to vector<128x32xf32>
    %cst = arith.constant 0.176776692 : f32
    %6 = vector.broadcast %cst : f32 to vector<8x32xf32>
    %7 = arith.mulf %1, %6 : vector<8x32xf32>
    %cst_8 = arith.constant dense<0.000000e+00> : vector<8x128xf32>
    %8 = tpu.matmul %7, %3, %cst_8 {dimension_numbers = #tpu.dot_dimension_numbers<[1], [1], [0], [0], [0, 0, 1, 0], [], []>} : vector<8x32xf32>, vector<128x32xf32>, vector<8x128xf32> -> vector<8x128xf32>
    %9 = tpu.iota {dimensions = array<i32: 1>} : vector<8x128xi32>
    %c8_i32 = arith.constant 8 : i32
    %10 = vector.broadcast %c8_i32 : i32 to vector<8x128xi32>
    %11 = arith.cmpi slt, %9, %10 : vector<8x128xi32>
    %cst_9 = arith.constant 0xFF800000 : f32
    %12 = vector.broadcast %cst_9 : f32 to vector<8x128xf32>
    %13 = arith.select %11, %8, %12 : vector<8x128xi1>, vector<8x128xf32>
    %cst_10 = arith.constant dense<0xFF800000> : vector<8xf32>
    %14 = vector.multi_reduction <maximumf>, %13, %cst_10 [1] : vector<8x128xf32> to vector<8xf32>
    %15 = vector.shape_cast %14 : vector<8xf32> to vector<8x1xf32>
    %16 = vector.broadcast %15 : vector<8x1xf32> to vector<8x128xf32>
    %17 = arith.subf %13, %16 : vector<8x128xf32>
    %18 = math.exp %17 : vector<8x128xf32>
    %cst_11 = arith.constant dense<0.000000e+00> : vector<8xf32>
    %19 = vector.multi_reduction <add>, %18, %cst_11 [1] : vector<8x128xf32> to vector<8xf32>
    %20 = vector.shape_cast %19 : vector<8xf32> to vector<8x1xf32>
    %21 = tpu.reciprocal %20 : vector<8x1xf32> -> vector<8x1xf32>
    %cst_12 = arith.constant dense<0.000000e+00> : vector<8x32xf32>
    %22 = tpu.matmul %18, %5, %cst_12 {dimension_numbers = #tpu.dot_dimension_numbers<[1], [0], [0], [1], [0, 0, 1, 1], [], []>} : vector<8x128xf32>, vector<128x32xf32>, vector<8x32xf32> -> vector<8x32xf32>
    %23 = vector.broadcast %21 : vector<8x1xf32> to vector<8x32xf32>
    %24 = arith.mulf %22, %23 : vector<8x32xf32>
    %c0_13 = arith.constant 0 : index
    %c0_14 = arith.constant 0 : index
    %c0_15 = arith.constant 0 : index
    %25 = vector.load %arg5[%c0_13, %c0_14, %c0_15] : memref<1x8x32xf32, #tpu.memory_space<vmem>>, vector<1x8x32xf32>
    %26 = vector.shape_cast %25 : vector<1x8x32xf32> to vector<8x32xf32>
    %27 = vector.shape_cast %24 : vector<8x32xf32> to vector<1x8x32xf32>
    tpu.vector_store %arg5[%c0_13, %c0_14, %c0_15], %27 {strides = array<i32>} : memref<1x8x32xf32, #tpu.memory_space<vmem>>, vector<1x8x32xf32>,
    %28 = vector.broadcast %21 : vector<8x1xf32> to vector<8x128xf32>
    %29 = arith.mulf %18, %28 : vector<8x128xf32>
    %c0_16 = arith.constant 0 : index
    %c0_17 = arith.constant 0 : index
    %c0_18 = arith.constant 0 : index
    %30 = vector.load %arg6[%c0_16, %c0_17, %c0_18] : memref<1x8x128xf32, #tpu.memory_space<vmem>>, vector<1x8x128xf32>
    %31 = vector.shape_cast %30 : vector<1x8x128xf32> to vector<8x128xf32>
    %32 = vector.shape_cast %29 : vector<8x128xf32> to vector<1x8x128xf32>
    tpu.vector_store %arg6[%c0_16, %c0_17, %c0_18], %32 {strides = array<i32>} : memref<1x8x128xf32, #tpu.memory_space<vmem>>, vector<1x8x128xf32>,
    return
  }
  func.func @transform_0(%arg0: i32, %arg1: i32) -> (i32, i32, i32) {
    %c0_i32 = arith.constant 0 : i32
    %c0_i32_0 = arith.constant 0 : i32
    return %arg0, %arg1, %c0_i32 : i32, i32, i32
  }
  func.func @transform_1(%arg0: i32, %arg1: i32) -> (i32, i32, i32) {
    %c0_i32 = arith.constant 0 : i32
    %c0_i32_0 = arith.constant 0 : i32
    %c0_i32_1 = arith.constant 0 : i32
    return %arg0, %c0_i32, %c0_i32_0 : i32, i32, i32
  }
  func.func @transform_2(%arg0: i32, %arg1: i32) -> (i32, i32, i32) {
    %c0_i32 = arith.constant 0 : i32
    %c0_i32_0 = arith.constant 0 : i32
    %c0_i32_1 = arith.constant 0 : i32
    return %arg0, %c0_i32, %c0_i32_0 : i32, i32, i32
  }
  func.func @transform_3(%arg0: i32, %arg1: i32) -> (i32, i32, i32) {
    %c0_i32 = arith.constant 0 : i32
    %c0_i32_0 = arith.constant 0 : i32
    return %arg0, %arg1, %c0_i32 : i32, i32, i32
  }
  func.func @transform_4(%arg0: i32, %arg1: i32) -> (i32, i32, i32) {
    %c0_i32 = arith.constant 0 : i32
    %c0_i32_0 = arith.constant 0 : i32
    return %arg0, %arg1, %c0_i32 : i32, i32, i32
  }
}

module attributes {stable_mosaic.version = 11 : i64} {
  func.func @_attention_kernel(%arg0: i32, %arg1: i32, %arg2: memref<1x8x32xf32, #tpu.memory_space<vmem>>, %arg3: memref<1x128x32xf32, #tpu.memory_space<vmem>>, %arg4: memref<1x128x32xf32, #tpu.memory_space<vmem>>, %arg5: memref<1x8x32xf32, #tpu.memory_space<vmem>>, %arg6: memref<1x8x128xf32, #tpu.memory_space<vmem>>) attributes {dimension_semantics = [#tpu.dimension_semantics<parallel>, #tpu.dimension_semantics<parallel>], iteration_bounds = array<i64: 2, 1>, scalar_prefetch = 0 : i64, scratch_operands = 0 : i64, tpu.core_type = #tpu.core_type<tc>, window_params = [{transform_indices = @transform_0, window_bounds = array<i64: 1, 8, 32>}, {transform_indices = @transform_1, window_bounds = array<i64: 1, 128, 32>}, {transform_indices = @transform_2, window_bounds = array<i64: 1, 128, 32>}, {transform_indices = @transform_3, window_bounds = array<i64: 1, 8, 32>}, {transform_indices = @transform_4, window_bounds = array<i64: 1, 8, 128>}]} {
    %c0 = arith.constant 0 : index
    %c0_0 = arith.constant 0 : index
    %c0_1 = arith.constant 0 : index
    %0 = vector.load %arg2[%c0, %c0_0, %c0_1] : memref<1x8x32xf32, #tpu.memory_space<vmem>>, vector<1x8x32xf32>
    %1 = vector.shape_cast %0 : vector<1x8x32xf32> to vector<8x32xf32>
    %c0_2 = arith.constant 0 : index
    %c0_3 = arith.constant 0 : index
    %c0_4 = arith.constant 0 : index
    %2 = vector.load %arg3[%c0_2, %c0_3, %c0_4] : memref<1x128x32xf32, #tpu.memory_space<vmem>>, vector<1x128x32xf32>
    %3 = vector.shape_cast %2 : vector<1x128x32xf32> to vector<128x32xf32>
    %c0_5 = arith.constant 0 : index
    %c0_6 = arith.constant 0 : index
    %c0_7 = arith.constant 0 : index
    %4 = vector.load %arg4[%c0_5, %c0_6, %c0_7] : memref<1x128x32xf32, #tpu.memory_space<vmem>>, vector<1x128x32xf32>
    %5 = vector.shape_cast %4 : vector<1x128x32xf32> to vector<128x32xf32>
    %cst = arith.constant 0.176776692 : f32
    %6 = vector.broadcast %cst : f32 to vector<8x32xf32>
    %7 = arith.mulf %1, %6 : vector<8x32xf32>
    %cst_8 = arith.constant dense<0.000000e+00> : vector<8x128xf32>
    %8 = tpu.matmul %7, %3, %cst_8 {dimension_numbers = #tpu.dot_dimension_numbers<[1], [1], [0], [0], [0, 0, 1, 0], [], []>} : vector<8x32xf32>, vector<128x32xf32>, vector<8x128xf32> -> vector<8x128xf32>
    %9 = tpu.iota {dimensions = array<i32: 1>} : vector<8x128xi32>
    %c8_i32 = arith.constant 8 : i32
    %10 = vector.broadcast %c8_i32 : i32 to vector<8x128xi32>
    %11 = arith.cmpi slt, %9, %10 : vector<8x128xi32>
    %cst_9 = arith.constant 0xFF800000 : f32
    %12 = vector.broadcast %cst_9 : f32 to vector<8x128xf32>
    %13 = arith.select %11, %8, %12 : vector<8x128xi1>, vector<8x128xf32>
    %cst_10 = arith.constant dense<0xFF800000> : vector<8xf32>
    %14 = vector.multi_reduction <maximumf>, %13, %cst_10 [1] : vector<8x128xf32> to vector<8xf32>
    %15 = vector.shape_cast %14 : vector<8xf32> to vector<8x1xf32>
    %16 = vector.broadcast %15 : vector<8x1xf32> to vector<8x128xf32>
    %17 = arith.subf %13, %16 : vector<8x128xf32>
    %18 = math.exp %17 : vector<8x128xf32>
    %cst_11 = arith.constant dense<0.000000e+00> : vector<8xf32>
    %19 = vector.multi_reduction <add>, %18, %cst_11 [1] : vector<8x128xf32> to vector<8xf32>
    %20 = vector.shape_cast %19 : vector<8xf32> to vector<8x1xf32>
    %21 = tpu.reciprocal %20 : vector<8x1xf32> -> vector<8x1xf32>
    %cst_12 = arith.constant dense<0.000000e+00> : vector<8x32xf32>
    %22 = tpu.matmul %18, %5, %cst_12 {dimension_numbers = #tpu.dot_dimension_numbers<[1], [0], [0], [1], [0, 0, 1, 1], [], []>} : vector<8x128xf32>, vector<128x32xf32>, vector<8x32xf32> -> vector<8x32xf32>
    %23 = vector.broadcast %21 : vector<8x1xf32> to vector<8x32xf32>
    %24 = arith.mulf %22, %23 : vector<8x32xf32>
    %c0_13 = arith.constant 0 : index
    %c0_14 = arith.constant 0 : index
    %c0_15 = arith.constant 0 : index
    %25 = vector.load %arg5[%c0_13, %c0_14, %c0_15] : memref<1x8x32xf32, #tpu.memory_space<vmem>>, vector<1x8x32xf32>
    %26 = vector.shape_cast %25 : vector<1x8x32xf32> to vector<8x32xf32>
    %27 = vector.shape_cast %24 : vector<8x32xf32> to vector<1x8x32xf32>
    tpu.vector_store %arg5[%c0_13, %c0_14, %c0_15], %27 {strides = array<i32>} : memref<1x8x32xf32, #tpu.memory_space<vmem>>, vector<1x8x32xf32>,
    %28 = vector.broadcast %21 : vector<8x1xf32> to vector<8x128xf32>
    %29 = arith.mulf %18, %28 : vector<8x128xf32>
    %c0_16 = arith.constant 0 : index
    %c0_17 = arith.constant 0 : index
    %c0_18 = arith.constant 0 : index
    %30 = vector.load %arg6[%c0_16, %c0_17, %c0_18] : memref<1x8x128xf32, #tpu.memory_space<vmem>>, vector<1x8x128xf32>
    %31 = vector.shape_cast %30 : vector<1x8x128xf32> to vector<8x128xf32>
    %32 = vector.shape_cast %29 : vector<8x128xf32> to vector<1x8x128xf32>
    tpu.vector_store %arg6[%c0_16, %c0_17, %c0_18], %32 {strides = array<i32>} : memref<1x8x128xf32, #tpu.memory_space<vmem>>, vector<1x8x128xf32>,
    return
  }
  func.func @transform_0(%arg0: i32, %arg1: i32) -> (i32, i32, i32) {
    %c0_i32 = arith.constant 0 : i32
    %c0_i32_0 = arith.constant 0 : i32
    return %arg0, %arg1, %c0_i32 : i32, i32, i32
  }
  func.func @transform_1(%arg0: i32, %arg1: i32) -> (i32, i32, i32) {
    %c0_i32 = arith.constant 0 : i32
    %c0_i32_0 = arith.constant 0 : i32
    %c0_i32_1 = arith.constant 0 : i32
    return %arg0, %c0_i32, %c0_i32_0 : i32, i32, i32
  }
  func.func @transform_2(%arg0: i32, %arg1: i32) -> (i32, i32, i32) {
    %c0_i32 = arith.constant 0 : i32
    %c0_i32_0 = arith.constant 0 : i32
    %c0_i32_1 = arith.constant 0 : i32
    return %arg0, %c0_i32, %c0_i32_0 : i32, i32, i32
  }
  func.func @transform_3(%arg0: i32, %arg1: i32) -> (i32, i32, i32) {
    %c0_i32 = arith.constant 0 : i32
    %c0_i32_0 = arith.constant 0 : i32
    return %arg0, %arg1, %c0_i32 : i32, i32, i32
  }
  func.func @transform_4(%arg0: i32, %arg1: i32) -> (i32, i32, i32) {
    %c0_i32 = arith.constant 0 : i32
    %c0_i32_0 = arith.constant 0 : i32
    return %arg0, %arg1, %c0_i32 : i32, i32, i32
  }
}

</mosaic_0001>

<bundles_post_ra>
// kernel: tpu_custom_call.1
= control target key start
LH: loop header
LB: loop body
LE: loop exit
PB: predicated region body
PF: predicated region fallthrough
CT: control target
= control target key end

     0   :  { %10 = vsyncpa [#allocation3], 0  ;;  %s1026_s0 = inlined_call_operand.vmem [shape: f32[2,8,32], index: 0, kind: input, shape index: {}]   ;;  %s1027_s1 = inlined_call_operand.vmem [shape: f32[2,128,32], index: 1, kind: input, shape index: {}]   ;;  %s1028_s2 = inlined_call_operand.vmem [shape: f32[2,128,32], index: 2, kind: input, shape index: {}]   ;;  %s1029_s3 = inlined_call_operand.hbm [shape: f32[2,8,32], index: 3, kind: output, shape index: {0}]   ;;  %s1030_s4 = inlined_call_operand.hbm [shape: f32[2,8,128], index: 4, kind: output, shape index: {1}]  }
   0x1   :  { %12 = vsyncpa [#allocation3 + $0x1], 0 }
   0x2   :  { %13 = vsyncpa [#allocation5], 0 }
   0x3   :  { %15 = vsyncpa [#allocation5 + $0x1], 0  ;;  %s836_s15 = smov 0   ;;  %s838_s16 = smov 0  }
   0x4   :  { %s840_s17 = smov 0   ;;  %s842_s18 = smov 0  }
   0x5   :  { %s844_s19 = smov 0   ;;  %s846_s20 = smov 0  }
   0x6 LB: > { %s598_s21 = sadd.s32 4294967295, %s809_s20   ;;  %s599_s22 = sadd.s32 4294967294, %s809_s20   ;;  %s809_s20 = sphi %s846_s20, %s21_s20   ;;  %s805_s19 = sphi %s844_s19, %s1037_s19   ;;  %s801_s18 = sphi %s842_s18, %s1036_s18   ;;  %s797_s17 = sphi %s840_s17, %s1035_s17   ;;  %s793_s16 = sphi %s838_s16, %s1034_s16   ;;  %s789_s15 = sphi %s836_s15, %s1033_s15  }
   0x7   : > { %s33_s23 = sadd.s32 1, %s805_s19  ;;  %s122_s24 = sadd.s32 1, %s797_s17 }
   0x8   : > { %p35_p0 = scmp.ge.s32.totalorder %s33_s23, 2  ;;  %p132_p1 = scmp.ne.s32.totalorder %s797_s17, %s793_s16 }
   0x9   : > { %p133_p2 = scmp.eq.s32.totalorder %s598_s21, 1  ;;  %p138_p3 = scmp.ne.s32.totalorder %s793_s16, %s789_s15 }
   0xa   : > { %s1039_s23 = smov (%p35_p0, %s33_s23), 0  ;;  %p139_p5 = scmp.eq.s32.totalorder %s599_s22, 1 }
   0xb   : > { %p876_p4 = por %p133_p2, %p132_p1  ;;  %s117_s26 = ssub.s32 %s805_s19, %s1039_s23 }
   0xc   : > { %p602_p6 = scmp.ge.s32.totalorder %s809_s20, 1  ;;  %p120_p7 = scmp.eq.s32.totalorder %s117_s26, 0 }
   0xd   : > { %p883_p8 = por %p139_p5, %p138_p3  ;;  %p211_p9 = scmp.lt.s32.totalorder %s809_s20, 3 }
   0xe   : > { %s889_s28 = scalar_select %p120_p7, %s797_s17, %s122_s24  }
   0xf   : > { %p212_p10 = pnand %p602_p6, %p211_p9 }
  0x10   : > { %p254_p11 = scmp.lt.s32.totalorder (!%p212_p10), %s801_s18, 1  ;;  %s964_s21 = sand.u32 (!%p212_p10), 1, %s793_s16  }
  0x11   : > { %215 = sbr.rel (%p212_p10) target bundleno = 494 (0x1ee), region = 32  ;;  %s603_s22 = sshll.u32 (!%p212_p10), %s964_s21, 3 }
  0x12   : > { %s629_s24 = sshll.u32 (!%p212_p10), %s801_s18, 3  ;;  %s253_s10 = scalar_lea.vmem (!%p212_p10), [#allocation4], %s603_s22 }
  0x13   : > { %s427_s13 = scalar_lea.sflag (!%p212_p10), [#allocation3], %s964_s21 }
  0x16   : > { %s893_s29 = scalar_select %p254_p11, %s801_s18, 1  ;;  %vm305_vm0 = vcmask 261120   ;;  %v377_v28 = vlaneseq }
  0x18   : > { %s633_s30 = sshll.u32 %s893_s29, 7  ;;  %s605_s8 = sshll.u32 %s893_s29, 3  ;;  %v378_v29 = vand.u32 127, %v377_v28 }
  0x19   : > { %s901_s7 = scalar_lea.vmem %s1027_s1, %s633_s30  ;;  %s260_s11 = scalar_lea.vmem %s1026_s0, %s605_s8 }
  0x1a   : > { %v287_v0 = vld [vmem:[%s901_s7 + $0x78] sm:$0xff]  ;;  %v286_v1 = vld [vmem:[%s901_s7 + $0x70] sm:$0xff]  ;;  %v285_v2 = vld [vmem:[%s901_s7 + $0x68] sm:$0xff]  ;;  %s945_s14 = scalar_lea.vmem %s1028_s2, %s633_s30  ;;  %vm379_vm1 = vcmp.lt.s32.totalorder %v378_v29, 8  ;;  %s443_s30 = scalar_lea.hbm %s1029_s3, %s629_s24 }
  0x1b   : > { %610 = vmatpush.xpose.msk.msra.mxu0 %vm305_vm0, %v287_v0  ;;  %v284_v3 = vld [vmem:[%s901_s7 + $0x60] sm:$0xff]  ;;  %v283_v4 = vld [vmem:[%s901_s7 + $0x58] sm:$0xff]  ;;  %v282_v5 = vld [vmem:[%s901_s7 + $0x50] sm:$0xff]  ;;  %s246_s8 = scalar_lea.vmem [#allocation2], %s603_s22  ;;  %s447_s18 = sshll.u32 %s443_s30, 4  ;;  %s448_s18 = int_to_ptr.hbm [resolvable:$true] %s447_s18 }
  0x1c   : > { %v281_v6 = vld [vmem:[%s901_s7 + $0x48] sm:$0xff]  ;;  %v280_v7 = vld [vmem:[%s901_s7 + $0x40] sm:$0xff]  ;;  %v279_v8 = vld [vmem:[%s901_s7 + $0x38] sm:$0xff]  ;;  %s445_s9 = sshll.u32 %s246_s8, 4  ;;  %s719_s29 = scalar_lea.hbm %s1029_s3, 16  ;;  %s446_s9 = int_to_ptr.vmem [resolvable:$true] %s445_s9 }
  0x1d   : > { %v278_v9 = vld [vmem:[%s901_s7 + $0x30] sm:$0xff]  ;;  %v277_v10 = vld [vmem:[%s901_s7 + $0x28] sm:$0xff]  ;;  %v276_v11 = vld [vmem:[%s901_s7 + $0x20] sm:$0xff] }
  0x1e   : > { %v275_v12 = vld [vmem:[%s901_s7 + $0x18] sm:$0xff]  ;;  %v274_v13 = vld [vmem:[%s901_s7 + $0x10] sm:$0xff]  ;;  %v273_v14 = vld [vmem:[%s901_s7 + $0x8] sm:$0xff] }
  0x1f   : > { %611 = vmatpush.xpose.msk.msra.mxu0 %vm305_vm0, %v286_v1  ;;  %v271_v15 = vld [vmem:[%s260_s11] sm:$0xff]  ;;  %v303_v18 = vld [vmem:[%s945_s14 + $0x78] sm:$0xff]  ;;  %v302_v19 = vld [vmem:[%s945_s14 + $0x70] sm:$0xff]  ;;  %s460_s11 = sshll.u32 %s253_s10, 4  ;;  %s974_s11 = int_to_ptr.vmem [resolvable:$true] %s460_s11 }
  0x20   : > { %v272_v16 = vld [vmem:[%s901_s7] sm:$0xff]  ;;  %v304_v17 = vmul.f32 0.17677669, %v271_v15  ;;  %402 = vmatpush.msra.mxu1 %v303_v18  ;;  %v301_v20 = vld [vmem:[%s945_s14 + $0x68] sm:$0xff]  ;;  %v299_v22 = vld [vmem:[%s945_s14 + $0x58] sm:$0xff]  ;;  %s458_s7 = scalar_lea.hbm %s1030_s4, %s629_s24 }
  0x21   : > { %v300_v21 = vld [vmem:[%s945_s14 + $0x60] sm:$0xff]  ;;  %v298_v23 = vld [vmem:[%s945_s14 + $0x50] sm:$0xff]  ;;  %v297_v24 = vld [vmem:[%s945_s14 + $0x48] sm:$0xff]  ;;  %s462_s12 = sshll.u32 %s458_s7, 4  ;;  %s976_s12 = int_to_ptr.hbm [resolvable:$true] %s462_s12 }
  0x22   : > { %403 = vmatpush.msra.mxu1 %v302_v19  ;;  %v296_v25 = vld [vmem:[%s945_s14 + $0x40] sm:$0xff]  ;;  %v295_v26 = vld [vmem:[%s945_s14 + $0x38] sm:$0xff]  ;;  %v294_v27 = vld [vmem:[%s945_s14 + $0x30] sm:$0xff] }
  0x23   : > { %612 = vmatpush.xpose.msk.msra.mxu0 %vm305_vm0, %v285_v2  ;;  %v293_v32 = vld [vmem:[%s945_s14 + $0x28] sm:$0xff]  ;;  %v292_v33 = vld [vmem:[%s945_s14 + $0x20] sm:$0xff]  ;;  %v291_v34 = vld [vmem:[%s945_s14 + $0x18] sm:$0xff] }
  0x24   : > { %404 = vmatpush.msra.mxu1 %v301_v20  ;;  %v290_v35 = vld [vmem:[%s945_s14 + $0x10] sm:$0xff]  ;;  %v289_v36 = vld [vmem:[%s945_s14 + $0x8] sm:$0xff]  ;;  %v288_v37 = vld [vmem:[%s945_s14] sm:$0xff]  ;;  %s713_s14 = sshra.s32 %s448_s18, 4  ;;  %s714_s14 = int_to_ptr.hbm [resolvable:$true] %s713_s14 }
  0x25   : > { %s715_s24 = scalar_lea.hbm %s714_s14, 8  ;;  %p720_p1 = scmp.lt.s32.totalorder %s714_s14, %s1029_s3 }
  0x26   : > { %405 = vmatpush.msra.mxu1 %v300_v21  ;;  %p716_p12 = scmp.ne.s32.totalorder %s714_s14, %s715_s24  ;;  %p721_p2 = scmp.lt.s32.totalorder %s719_s29, %s715_s24 }
  0x27   : > { %613 = vmatpush.xpose.msk.msra.mxu0 %vm305_vm0, %v284_v3 }
  0x28   : > { %406 = vmatpush.msra.mxu1 %v299_v22  ;;  %p717_p13 = pnand %p716_p12, %p876_p4  ;;  %p722_p3 = por %p721_p2, %p720_p1 }
  0x2a   : > { %407 = vmatpush.msra.mxu1 %v298_v23  ;;  %p718_p0 = pneg %p717_p13 }
  0x2b   : > { %614 = vmatpush.xpose.msk.msra.mxu0 %vm305_vm0, %v283_v4 }
  0x2c   : > { %408 = vmatpush.msra.mxu1 %v297_v24  ;;  %p723_p5 = pnand %p722_p3, %p718_p0 }
  0x2e   : > { %409 = vmatpush.msra.mxu1 %v296_v25 }
  0x2f   : > { %615 = vmatpush.xpose.msk.msra.mxu0 %vm305_vm0, %v282_v5 }
  0x30   : > { %410 = vmatpush.msra.mxu1 %v295_v26 }
  0x32   : > { %411 = vmatpush.msra.mxu1 %v294_v27 }
  0x33   : > { %616 = vmatpush.xpose.msk.msra.mxu0 %vm305_vm0, %v281_v6 }
  0x34   : > { %412 = vmatpush.msra.mxu1 %v293_v32 }
  0x36   : > { %413 = vmatpush.msra.mxu1 %v292_v33 }
  0x37   : > { %617 = vmatpush.xpose.msk.msra.mxu0 %vm305_vm0, %v280_v7 }
  0x38   : > { %414 = vmatpush.msra.mxu1 %v291_v34 }
  0x3a   : > { %415 = vmatpush.msra.mxu1 %v290_v35 }
  0x3b   : > { %618 = vmatpush.xpose.msk.msra.mxu0 %vm305_vm0, %v279_v8 }
  0x3c   : > { %416 = vmatpush.msra.mxu1 %v289_v36 }
  0x3e   : > { %417 = vmatpush.msra.mxu1 %v288_v37 }
  0x3f   : > { %619 = vmatpush.xpose.msk.msra.mxu0 %vm305_vm0, %v278_v9 }
  0x43   : > { %620 = vmatpush.xpose.msk.msra.mxu0 %vm305_vm0, %v277_v10 }
  0x47   : > { %621 = vmatpush.xpose.msk.msra.mxu0 %vm305_vm0, %v276_v11 }
  0x4b   : > { %622 = vmatpush.xpose.msk.msra.mxu0 %vm305_vm0, %v275_v12 }
  0x4f   : > { %623 = vmatpush.xpose.msk.msra.mxu0 %vm305_vm0, %v274_v13 }
  0x53   : > { %624 = vmatpush.xpose.msk.msra.mxu0 %vm305_vm0, %v273_v14 }
  0x57   : > { %625 = vmatpush.xpose.msk.msra.mxu0 %vm305_vm0, %v272_v16 }
  0x5a   : > { %626 = vmatmul.msk.f32.vlgmr.msra.gmra.mxu0 %vm305_vm0, %v304_v17 }
  0xd7   : > { %v374_v30 = vpop.f32.mrf.mxu0 }
  0xd8   : > { %v380_v31 = vsel %vm379_vm1, %v374_v30, -inf }
  0xd9   : > { %381 = vmax.xlane.f32.xlu0 %v380_v31 }
 0x14c   : > { %v382_v38 = vpop.xlane.xlu0 %381 }
 0x14d   : > { %v383_v39 = vsub.f32 %v380_v31, %v382_v38 }
 0x14f   : > { %v384_v40 = vmul.f32 1.442695, %v383_v39 }
 0x151   : > { %695 = vpow2.f32 %v384_v40 }
 0x157   : > { %v696_v41 = vpop.eup %695 }
 0x158   : > { %386 = vadd.xlane.f32.xlu0 %v696_v41  ;;  %418 = vmatmul.f32.vlgmr.msra.gmra.mxu1 %v696_v41 }
 0x1cb   : > { %v387_v42 = vpop.xlane.xlu0 %386 }
 0x1cc   : > { %697 = vrcp.f32 %v387_v42  ;;  %v399_v46 = vand.u32 2147483648, %v387_v42  ;;  %v397_v48 = vand.u32 2147483647, %v387_v42  ;;  %vm393_vm3 = vweird.f32 %v387_v42 }
 0x1ce   : > { %v400_v50 = vor.u32 1.1754944e-38, %v399_v46  ;;  %vm398_vm5 = vcmp.eq.f32.partialorder %v397_v48, 8.507059e+37 }
 0x1d2   : > { %v698_v43 = vpop.eup %697 }
 0x1d3   : > { %v389_v44 = vmul.f32 %v698_v43, %v387_v42  ;;  %vm394_vm2 = vweird.f32 %v698_v43 }
 0x1d4   : > { %vm395_vm4 = vmor %vm393_vm3, %vm394_vm2 }
 0x1d5   : > { %v390_v45 = vsub.f32 1.0, %v389_v44  ;;  %v419_v53 = vpop.f32.mrf.mxu1 }
 0x1d7   : > { %v391_v47 = vmul.f32 %v698_v43, %v390_v45 }
 0x1d9   : > { %v392_v49 = vadd.f32 %v698_v43, %v391_v47 }
 0x1db   : > { %v396_v51 = vsel %vm395_vm4, %v698_v43, %v392_v49 }
 0x1dc   : > { %v401_v52 = vsel %vm398_vm5, %v400_v50, %v396_v51 }
 0x1dd   : > { %v422_v54 = vmul.f32 %v419_v53, %v401_v52  ;;  %v424_v55 = vmul.f32 %v696_v41, %v401_v52 }
 0x1df   : > { %423 = vst.msk [vmem:[%s246_s8] sm:$0xff] %vm305_vm0, %v422_v54 }
 0x1e0   : > { %726 = shalt.err (!%p723_p5)
}
 0x1e1   : > { %635 = dma.vmem_to_hbm [thread:$0]  (%p876_p4), %s446_s9, 128, %s448_s18, %s427_s13   ;;  %425 = vst [vmem:[%s253_s10] sm:$0xff] %v424_v55 }
 0x1e2   : > { %s432_s6 = scalar_lea.sflag [#allocation5], %s964_s21  ;;  %s741_s7 = sshra.s32 %s976_s12, 4  ;;  %s742_s7 = int_to_ptr.hbm [resolvable:$true] %s741_s7 }
 0x1e3   : > { %s743_s8 = scalar_lea.hbm %s742_s7, 8  ;;  %s747_s22 = scalar_lea.hbm %s1030_s4, 16 }
 0x1e4   : > { %p744_p6 = scmp.ne.s32.totalorder %s742_s7, %s743_s8  ;;  %p748_p10 = scmp.lt.s32.totalorder %s742_s7, %s1030_s4 }
 0x1e5   : > { %p749_p11 = scmp.lt.s32.totalorder %s747_s22, %s743_s8 }
 0x1e6   : > { %p745_p7 = pnand %p744_p6, %p876_p4 }
 0x1e7   : > { %p750_p12 = por %p749_p11, %p748_p10 }
 0x1e8   : > { %p746_p9 = pneg %p745_p7 }
 0x1ea   : > { %p751_p13 = pnand %p750_p12, %p746_p9 }
 0x1ec   : > { %754 = shalt.err (!%p751_p13)
}
 0x1ed   : > { %636 = dma.vmem_to_hbm [thread:$0]  (%p876_p4), %s974_s11, 128, %s976_s12, %s432_s6  }
 0x1ee PF: > { %p646_p0 = scmp.ge.s32.totalorder %s809_s20, 2  ;;  %s474_s21 = sand.u32 1, %s789_s15  }
 0x1ef   : > { %s475_s9 = scalar_lea.sflag [#allocation3], %s474_s21 }
 0x1f0   : > { %p640_p1 = pnand %p646_p0, %p883_p8 }
 0x1f2   : > { %p641_p2 = pneg %p640_p1 }
 0x1f4   : > { %780 = dma.done.wait (%p641_p2), %s475_s9, 128  }
 0x1f5   : > { %782 = vsyncadd (%p641_p2), %s475_s9, 4294967168  ;;  %s485_s18 = scalar_lea.sflag [#allocation5], %s474_s21 }
 0x1f6   : > { %784 = dma.done.wait (%p641_p2), %s485_s18, 128  }
 0x1f7   : > { %786 = vsyncadd (%p641_p2), %s485_s18, 4294967168  ;;  %s21_s20 = sadd.s32 1, %s809_s20   ;;  %s1033_s15 = smov %s793_s16 }
 0x1f8   : > { %p18_p3 = scmp.ge.s32.totalorder %s21_s20, 4   ;;  %s1034_s16 = smov %s797_s17 }
 0x1f9   : > { %s1035_s17 = smov %s889_s28  ;;  %s1036_s18 = smov %s805_s19 }
 0x1fa   : > { %s1037_s19 = smov %s1039_s23  ;;  %20 = sbr.rel (!%p18_p3) target bundleno = 6 (0x6), region = 90 }
 0x1ff   :  { %491 = vsyncpa [#allocation3], 1 }
 0x200   :  { %493 = vsyncpa [#allocation3 + $0x1], 1 }
 0x201   :  { %494 = vsyncpa [#allocation5], 1 }
 0x202   :  { %496 = vsyncpa [#allocation5 + $0x1], 1 }

// kernel: tpu_custom_call.1
= control target key start
LH: loop header
LB: loop body
LE: loop exit
PB: predicated region body
PF: predicated region fallthrough
CT: control target
= control target key end

     0   :  { %10 = vsyncpa [#allocation3], 0  ;;  %s1020_s0 = inlined_call_operand.vmem [shape: f32[2,8,32], index: 0, kind: input, shape index: {}]   ;;  %s1021_s1 = inlined_call_operand.vmem [shape: f32[2,128,32], index: 1, kind: input, shape index: {}]   ;;  %s1022_s2 = inlined_call_operand.vmem [shape: f32[2,128,32], index: 2, kind: input, shape index: {}]   ;;  %s1023_s3 = inlined_call_operand.hbm [shape: f32[2,8,32], index: 3, kind: output, shape index: {0}]   ;;  %s1024_s4 = inlined_call_operand.hbm [shape: f32[2,8,128], index: 4, kind: output, shape index: {1}]  }
   0x1   :  { %12 = vsyncpa [#allocation3 + $0x1], 0 }
   0x2   :  { %13 = vsyncpa [#allocation5], 0 }
   0x3   :  { %15 = vsyncpa [#allocation5 + $0x1], 0  ;;  %s830_s15 = smov 0   ;;  %s832_s16 = smov 0  }
   0x4   :  { %s834_s17 = smov 0   ;;  %s836_s18 = smov 0  }
   0x5   :  { %s838_s19 = smov 0   ;;  %s840_s20 = smov 0  }
   0x6 LB: > { %s592_s21 = sadd.s32 4294967295, %s803_s20   ;;  %s593_s22 = sadd.s32 4294967294, %s803_s20   ;;  %s803_s20 = sphi %s840_s20, %s21_s20   ;;  %s799_s19 = sphi %s838_s19, %s1031_s19   ;;  %s795_s18 = sphi %s836_s18, %s1030_s18   ;;  %s791_s17 = sphi %s834_s17, %s1029_s17   ;;  %s787_s16 = sphi %s832_s16, %s1028_s16   ;;  %s783_s15 = sphi %s830_s15, %s1027_s15  }
   0x7   : > { %s33_s23 = sadd.s32 1, %s799_s19  ;;  %s122_s24 = sadd.s32 1, %s791_s17 }
   0x8   : > { %p35_p0 = scmp.ge.s32.totalorder %s33_s23, 2  ;;  %p132_p1 = scmp.ne.s32.totalorder %s791_s17, %s787_s16 }
   0x9   : > { %p133_p2 = scmp.eq.s32.totalorder %s592_s21, 1  ;;  %p138_p3 = scmp.ne.s32.totalorder %s787_s16, %s783_s15 }
   0xa   : > { %s1033_s23 = smov (%p35_p0, %s33_s23), 0  ;;  %p139_p5 = scmp.eq.s32.totalorder %s593_s22, 1 }
   0xb   : > { %p870_p4 = por %p133_p2, %p132_p1  ;;  %s117_s26 = ssub.s32 %s799_s19, %s1033_s23 }
   0xc   : > { %p596_p6 = scmp.ge.s32.totalorder %s803_s20, 1  ;;  %p120_p7 = scmp.eq.s32.totalorder %s117_s26, 0 }
   0xd   : > { %p877_p8 = por %p139_p5, %p138_p3  ;;  %p211_p9 = scmp.lt.s32.totalorder %s803_s20, 3 }
   0xe   : > { %s883_s28 = scalar_select %p120_p7, %s791_s17, %s122_s24  }
   0xf   : > { %p212_p10 = pnand %p596_p6, %p211_p9 }
  0x10   : > { %p254_p11 = scmp.lt.s32.totalorder (!%p212_p10), %s795_s18, 1  ;;  %s958_s21 = sand.u32 (!%p212_p10), 1, %s787_s16  }
  0x11   : > { %215 = sbr.rel (%p212_p10) target bundleno = 494 (0x1ee), region = 32  ;;  %s597_s22 = sshll.u32 (!%p212_p10), %s958_s21, 3 }
  0x12   : > { %s623_s24 = sshll.u32 (!%p212_p10), %s795_s18, 3  ;;  %s253_s10 = scalar_lea.vmem (!%p212_p10), [#allocation4], %s597_s22 }
  0x13   : > { %s427_s13 = scalar_lea.sflag (!%p212_p10), [#allocation3], %s958_s21 }
  0x16   : > { %s887_s29 = scalar_select %p254_p11, %s795_s18, 1  ;;  %vm305_vm0 = vcmask 261120   ;;  %v377_v28 = vlaneseq }
  0x18   : > { %s627_s30 = sshll.u32 %s887_s29, 7  ;;  %s599_s8 = sshll.u32 %s887_s29, 3  ;;  %v378_v29 = vand.u32 127, %v377_v28 }
  0x19   : > { %s895_s7 = scalar_lea.vmem %s1021_s1, %s627_s30  ;;  %s260_s11 = scalar_lea.vmem %s1020_s0, %s599_s8 }
  0x1a   : > { %v287_v0 = vld [vmem:[%s895_s7 + $0x78] sm:$0xff]  ;;  %v286_v1 = vld [vmem:[%s895_s7 + $0x70] sm:$0xff]  ;;  %v285_v2 = vld [vmem:[%s895_s7 + $0x68] sm:$0xff]  ;;  %s939_s14 = scalar_lea.vmem %s1022_s2, %s627_s30  ;;  %vm379_vm1 = vcmp.lt.s32.totalorder %v378_v29, 8  ;;  %s443_s30 = scalar_lea.hbm %s1023_s3, %s623_s24 }
  0x1b   : > { %604 = vmatpush.xpose.msk.msra.mxu0 %vm305_vm0, %v287_v0  ;;  %v284_v3 = vld [vmem:[%s895_s7 + $0x60] sm:$0xff]  ;;  %v283_v4 = vld [vmem:[%s895_s7 + $0x58] sm:$0xff]  ;;  %v282_v5 = vld [vmem:[%s895_s7 + $0x50] sm:$0xff]  ;;  %s246_s8 = scalar_lea.vmem [#allocation2], %s597_s22  ;;  %s447_s18 = sshll.u32 %s443_s30, 4  ;;  %s448_s18 = int_to_ptr.hbm [resolvable:$true] %s447_s18 }
  0x1c   : > { %v281_v6 = vld [vmem:[%s895_s7 + $0x48] sm:$0xff]  ;;  %v280_v7 = vld [vmem:[%s895_s7 + $0x40] sm:$0xff]  ;;  %v279_v8 = vld [vmem:[%s895_s7 + $0x38] sm:$0xff]  ;;  %s445_s9 = sshll.u32 %s246_s8, 4  ;;  %s713_s29 = scalar_lea.hbm %s1023_s3, 16  ;;  %s446_s9 = int_to_ptr.vmem [resolvable:$true] %s445_s9 }
  0x1d   : > { %v278_v9 = vld [vmem:[%s895_s7 + $0x30] sm:$0xff]  ;;  %v277_v10 = vld [vmem:[%s895_s7 + $0x28] sm:$0xff]  ;;  %v276_v11 = vld [vmem:[%s895_s7 + $0x20] sm:$0xff] }
  0x1e   : > { %v275_v12 = vld [vmem:[%s895_s7 + $0x18] sm:$0xff]  ;;  %v274_v13 = vld [vmem:[%s895_s7 + $0x10] sm:$0xff]  ;;  %v273_v14 = vld [vmem:[%s895_s7 + $0x8] sm:$0xff] }
  0x1f   : > { %605 = vmatpush.xpose.msk.msra.mxu0 %vm305_vm0, %v286_v1  ;;  %v271_v15 = vld [vmem:[%s260_s11] sm:$0xff]  ;;  %v303_v18 = vld [vmem:[%s939_s14 + $0x78] sm:$0xff]  ;;  %v302_v19 = vld [vmem:[%s939_s14 + $0x70] sm:$0xff]  ;;  %s460_s11 = sshll.u32 %s253_s10, 4  ;;  %s968_s11 = int_to_ptr.vmem [resolvable:$true] %s460_s11 }
  0x20   : > { %v272_v16 = vld [vmem:[%s895_s7] sm:$0xff]  ;;  %v304_v17 = vmul.f32 0.17677669, %v271_v15  ;;  %402 = vmatpush.msra.mxu1 %v303_v18  ;;  %v301_v20 = vld [vmem:[%s939_s14 + $0x68] sm:$0xff]  ;;  %v299_v22 = vld [vmem:[%s939_s14 + $0x58] sm:$0xff]  ;;  %s458_s7 = scalar_lea.hbm %s1024_s4, %s623_s24 }
  0x21   : > { %v300_v21 = vld [vmem:[%s939_s14 + $0x60] sm:$0xff]  ;;  %v298_v23 = vld [vmem:[%s939_s14 + $0x50] sm:$0xff]  ;;  %v297_v24 = vld [vmem:[%s939_s14 + $0x48] sm:$0xff]  ;;  %s462_s12 = sshll.u32 %s458_s7, 4  ;;  %s970_s12 = int_to_ptr.hbm [resolvable:$true] %s462_s12 }
  0x22   : > { %403 = vmatpush.msra.mxu1 %v302_v19  ;;  %v296_v25 = vld [vmem:[%s939_s14 + $0x40] sm:$0xff]  ;;  %v295_v26 = vld [vmem:[%s939_s14 + $0x38] sm:$0xff]  ;;  %v294_v27 = vld [vmem:[%s939_s14 + $0x30] sm:$0xff] }
  0x23   : > { %606 = vmatpush.xpose.msk.msra.mxu0 %vm305_vm0, %v285_v2  ;;  %v293_v32 = vld [vmem:[%s939_s14 + $0x28] sm:$0xff]  ;;  %v292_v33 = vld [vmem:[%s939_s14 + $0x20] sm:$0xff]  ;;  %v291_v34 = vld [vmem:[%s939_s14 + $0x18] sm:$0xff] }
  0x24   : > { %404 = vmatpush.msra.mxu1 %v301_v20  ;;  %v290_v35 = vld [vmem:[%s939_s14 + $0x10] sm:$0xff]  ;;  %v289_v36 = vld [vmem:[%s939_s14 + $0x8] sm:$0xff]  ;;  %v288_v37 = vld [vmem:[%s939_s14] sm:$0xff]  ;;  %s707_s14 = sshra.s32 %s448_s18, 4  ;;  %s708_s14 = int_to_ptr.hbm [resolvable:$true] %s707_s14 }
  0x25   : > { %s709_s24 = scalar_lea.hbm %s708_s14, 8  ;;  %p714_p1 = scmp.lt.s32.totalorder %s708_s14, %s1023_s3 }
  0x26   : > { %405 = vmatpush.msra.mxu1 %v300_v21  ;;  %p710_p12 = scmp.ne.s32.totalorder %s708_s14, %s709_s24  ;;  %p715_p2 = scmp.lt.s32.totalorder %s713_s29, %s709_s24 }
  0x27   : > { %607 = vmatpush.xpose.msk.msra.mxu0 %vm305_vm0, %v284_v3 }
  0x28   : > { %406 = vmatpush.msra.mxu1 %v299_v22  ;;  %p711_p13 = pnand %p710_p12, %p870_p4  ;;  %p716_p3 = por %p715_p2, %p714_p1 }
  0x2a   : > { %407 = vmatpush.msra.mxu1 %v298_v23  ;;  %p712_p0 = pneg %p711_p13 }
  0x2b   : > { %608 = vmatpush.xpose.msk.msra.mxu0 %vm305_vm0, %v283_v4 }
  0x2c   : > { %408 = vmatpush.msra.mxu1 %v297_v24  ;;  %p717_p5 = pnand %p716_p3, %p712_p0 }
  0x2e   : > { %409 = vmatpush.msra.mxu1 %v296_v25 }
  0x2f   : > { %609 = vmatpush.xpose.msk.msra.mxu0 %vm305_vm0, %v282_v5 }
  0x30   : > { %410 = vmatpush.msra.mxu1 %v295_v26 }
  0x32   : > { %411 = vmatpush.msra.mxu1 %v294_v27 }
  0x33   : > { %610 = vmatpush.xpose.msk.msra.mxu0 %vm305_vm0, %v281_v6 }
  0x34   : > { %412 = vmatpush.msra.mxu1 %v293_v32 }
  0x36   : > { %413 = vmatpush.msra.mxu1 %v292_v33 }
  0x37   : > { %611 = vmatpush.xpose.msk.msra.mxu0 %vm305_vm0, %v280_v7 }
  0x38   : > { %414 = vmatpush.msra.mxu1 %v291_v34 }
  0x3a   : > { %415 = vmatpush.msra.mxu1 %v290_v35 }
  0x3b   : > { %612 = vmatpush.xpose.msk.msra.mxu0 %vm305_vm0, %v279_v8 }
  0x3c   : > { %416 = vmatpush.msra.mxu1 %v289_v36 }
  0x3e   : > { %417 = vmatpush.msra.mxu1 %v288_v37 }
  0x3f   : > { %613 = vmatpush.xpose.msk.msra.mxu0 %vm305_vm0, %v278_v9 }
  0x43   : > { %614 = vmatpush.xpose.msk.msra.mxu0 %vm305_vm0, %v277_v10 }
  0x47   : > { %615 = vmatpush.xpose.msk.msra.mxu0 %vm305_vm0, %v276_v11 }
  0x4b   : > { %616 = vmatpush.xpose.msk.msra.mxu0 %vm305_vm0, %v275_v12 }
  0x4f   : > { %617 = vmatpush.xpose.msk.msra.mxu0 %vm305_vm0, %v274_v13 }
  0x53   : > { %618 = vmatpush.xpose.msk.msra.mxu0 %vm305_vm0, %v273_v14 }
  0x57   : > { %619 = vmatpush.xpose.msk.msra.mxu0 %vm305_vm0, %v272_v16 }
  0x5a   : > { %620 = vmatmul.msk.f32.vlgmr.msra.gmra.mxu0 %vm305_vm0, %v304_v17 }
  0xd7   : > { %v374_v30 = vpop.f32.mrf.mxu0 }
  0xd8   : > { %v380_v31 = vsel %vm379_vm1, %v374_v30, -inf }
  0xd9   : > { %381 = vmax.xlane.f32.xlu0 %v380_v31 }
 0x14c   : > { %v382_v38 = vpop.xlane.xlu0 %381 }
 0x14d   : > { %v383_v39 = vsub.f32 %v380_v31, %v382_v38 }
 0x14f   : > { %v384_v40 = vmul.f32 1.442695, %v383_v39 }
 0x151   : > { %689 = vpow2.f32 %v384_v40 }
 0x157   : > { %v690_v41 = vpop.eup %689 }
 0x158   : > { %386 = vadd.xlane.f32.xlu0 %v690_v41  ;;  %418 = vmatmul.f32.vlgmr.msra.gmra.mxu1 %v690_v41 }
 0x1cb   : > { %v387_v42 = vpop.xlane.xlu0 %386 }
 0x1cc   : > { %691 = vrcp.f32 %v387_v42  ;;  %v399_v46 = vand.u32 2147483648, %v387_v42  ;;  %v397_v48 = vand.u32 2147483647, %v387_v42  ;;  %vm393_vm3 = vweird.f32 %v387_v42 }
 0x1ce   : > { %v400_v50 = vor.u32 1.1754944e-38, %v399_v46  ;;  %vm398_vm5 = vcmp.eq.f32.partialorder %v397_v48, 8.507059e+37 }
 0x1d2   : > { %v692_v43 = vpop.eup %691 }
 0x1d3   : > { %v389_v44 = vmul.f32 %v692_v43, %v387_v42  ;;  %vm394_vm2 = vweird.f32 %v692_v43 }
 0x1d4   : > { %vm395_vm4 = vmor %vm393_vm3, %vm394_vm2 }
 0x1d5   : > { %v390_v45 = vsub.f32 1.0, %v389_v44  ;;  %v419_v53 = vpop.f32.mrf.mxu1 }
 0x1d7   : > { %v391_v47 = vmul.f32 %v692_v43, %v390_v45 }
 0x1d9   : > { %v392_v49 = vadd.f32 %v692_v43, %v391_v47 }
 0x1db   : > { %v396_v51 = vsel %vm395_vm4, %v692_v43, %v392_v49 }
 0x1dc   : > { %v401_v52 = vsel %vm398_vm5, %v400_v50, %v396_v51 }
 0x1dd   : > { %v422_v54 = vmul.f32 %v419_v53, %v401_v52  ;;  %v424_v55 = vmul.f32 %v690_v41, %v401_v52 }
 0x1df   : > { %423 = vst.msk [vmem:[%s246_s8] sm:$0xff] %vm305_vm0, %v422_v54 }
 0x1e0   : > { %720 = shalt.err (!%p717_p5)
}
 0x1e1   : > { %629 = dma.vmem_to_hbm [thread:$0]  (%p870_p4), %s446_s9, 128, %s448_s18, %s427_s13   ;;  %425 = vst [vmem:[%s253_s10] sm:$0xff] %v424_v55 }
 0x1e2   : > { %s432_s6 = scalar_lea.sflag [#allocation5], %s958_s21  ;;  %s735_s7 = sshra.s32 %s970_s12, 4  ;;  %s736_s7 = int_to_ptr.hbm [resolvable:$true] %s735_s7 }
 0x1e3   : > { %s737_s8 = scalar_lea.hbm %s736_s7, 8  ;;  %s741_s22 = scalar_lea.hbm %s1024_s4, 16 }
 0x1e4   : > { %p738_p6 = scmp.ne.s32.totalorder %s736_s7, %s737_s8  ;;  %p742_p10 = scmp.lt.s32.totalorder %s736_s7, %s1024_s4 }
 0x1e5   : > { %p743_p11 = scmp.lt.s32.totalorder %s741_s22, %s737_s8 }
 0x1e6   : > { %p739_p7 = pnand %p738_p6, %p870_p4 }
 0x1e7   : > { %p744_p12 = por %p743_p11, %p742_p10 }
 0x1e8   : > { %p740_p9 = pneg %p739_p7 }
 0x1ea   : > { %p745_p13 = pnand %p744_p12, %p740_p9 }
 0x1ec   : > { %748 = shalt.err (!%p745_p13)
}
 0x1ed   : > { %630 = dma.vmem_to_hbm [thread:$0]  (%p870_p4), %s968_s11, 128, %s970_s12, %s432_s6  }
 0x1ee PF: > { %p640_p0 = scmp.ge.s32.totalorder %s803_s20, 2  ;;  %s474_s21 = sand.u32 1, %s783_s15  }
 0x1ef   : > { %s475_s9 = scalar_lea.sflag [#allocation3], %s474_s21 }
 0x1f0   : > { %p634_p1 = pnand %p640_p0, %p877_p8 }
 0x1f2   : > { %p635_p2 = pneg %p634_p1 }
 0x1f4   : > { %774 = dma.done.wait (%p635_p2), %s475_s9, 128  }
 0x1f5   : > { %776 = vsyncadd (%p635_p2), %s475_s9, 4294967168  ;;  %s485_s18 = scalar_lea.sflag [#allocation5], %s474_s21 }
 0x1f6   : > { %778 = dma.done.wait (%p635_p2), %s485_s18, 128  }
 0x1f7   : > { %780 = vsyncadd (%p635_p2), %s485_s18, 4294967168  ;;  %s21_s20 = sadd.s32 1, %s803_s20   ;;  %s1027_s15 = smov %s787_s16 }
 0x1f8   : > { %p18_p3 = scmp.ge.s32.totalorder %s21_s20, 4   ;;  %s1028_s16 = smov %s791_s17 }
 0x1f9   : > { %s1029_s17 = smov %s883_s28  ;;  %s1030_s18 = smov %s799_s19 }
 0x1fa   : > { %s1031_s19 = smov %s1033_s23  ;;  %20 = sbr.rel (!%p18_p3) target bundleno = 6 (0x6), region = 90 }
 0x1ff   :  { %491 = vsyncpa [#allocation3], 1 }
 0x200   :  { %493 = vsyncpa [#allocation3 + $0x1], 1 }
 0x201   :  { %494 = vsyncpa [#allocation5], 1 }
 0x202   :  { %496 = vsyncpa [#allocation5 + $0x1], 1 }

</bundles_post_ra>
